<compile_context>
chip_gen: v5e
topology: v5e:2x2
jax: 0.10.0
libtpu: 0.0.40
codegen_flags: <defaults>
</compile_context>

<pallas_src>
import jax
import jax.numpy as jnp
from jax.experimental import pallas as pl
from jax.experimental.pallas import tpu as pltpu

LANES = 128      # vreg lane width
SUBLANES = 8     # vreg sublane count (f32)


def _round_up(x, m):
    return ((x + m - 1) // m) * m


def _fused_linear_kernel(x_ref, wf_ref, bf_ref, o_ref):
    # (TB, D_in)bf16 @ (D_in, 128)bf16 with f32 accumulation on the MXU.
    acc = jnp.dot(x_ref[...], wf_ref[...], preferred_element_type=jnp.float32)
    # Bias add + cast/store kept in f32 on the VPU (free under the MXU/store slots).
    o_ref[...] = (acc + bf_ref[...]).astype(o_ref.dtype)


def prepare_params(w1, b1, w2, b2, *, lane_pad=LANES):
    """One-time setup: fuse the two bias-only Linears and pad the output lane dim to 128.

    Inputs are stored pre-transposed vs PyTorch: w1 (D_in, H), b1 (1, H), w2 (H, D_out), b2 (1, D_out).
    Returns (wf bf16 (D_in, Dp), bf f32 (1, Dp), d_out) with Dp = round_up(D_out, 128).
    """
    wf = jnp.dot(w1, w2, preferred_element_type=jnp.float32)        # (D_in, D_out)
    bf = jnp.dot(b1, w2, preferred_element_type=jnp.float32) + b2   # (1, D_out)
    d_out = wf.shape[1]
    d_pad = _round_up(d_out, lane_pad)
    wf = jnp.pad(wf, ((0, 0), (0, d_pad - d_out))).astype(jnp.bfloat16)
    bf = jnp.pad(bf, ((0, 0), (0, d_pad - d_out))).astype(jnp.float32)
    return wf, bf, d_out


def fashion_mnist_model_v0(x_nchw, wf, bf, d_out, *, batch_tile=128):
    """Forward pass. x_nchw: (B, C, H, W) float32. Returns (B, d_out) float32."""
    B = x_nchw.shape[0]
    d_in, d_pad = wf.shape

    # nn.Flatten(): (B, C, H, W) -> (B, C*H*W), row-major, identical to PyTorch.
    x_flat = x_nchw.reshape(B, -1)
    assert x_flat.shape[1] == d_in

    # Activations to bf16 for the MXU path (accumulation stays f32 inside the kernel).
    x_flat = x_flat.astype(jnp.bfloat16)

    # Batch tile: at most 128 rows/step, at least sublane-aligned; pad B to a multiple of it.
    tb = min(batch_tile, _round_up(B, SUBLANES))
    b_pad = _round_up(B, tb)
    if b_pad != B:
        x_flat = jnp.pad(x_flat, ((0, b_pad - B), (0, 0)))

    out = pl.pallas_call(
        _fused_linear_kernel,
        out_shape=jax.ShapeDtypeStruct((b_pad, d_pad), jnp.float32),
        grid=(b_pad // tb,),
        in_specs=[
            pl.BlockSpec((tb, d_in), lambda i: (i, 0)),     # x tile: pipelined over batch
            pl.BlockSpec((d_in, d_pad), lambda i: (0, 0)),  # fused weight: VMEM-resident
            pl.BlockSpec((1, d_pad), lambda i: (0, 0)),     # fused bias:   VMEM-resident
        ],
        out_specs=pl.BlockSpec((tb, d_pad), lambda i: (i, 0)),  # lane-dense (128-wide) stores
        compiler_params=pltpu.CompilerParams(
            dimension_semantics=("parallel",)),
    )(x_flat, wf, bf)

    # Drop batch padding and the zero lane padding.
    return out[:B, :d_out]


def init_params(key, input_shape, hidden_units, output_shape):
    """PyTorch Linear default init: U(-1/sqrt(fan_in), +1/sqrt(fan_in)).
    Weights stored pre-transposed: (fan_in, fan_out)."""
    k1, k2, k3, k4 = jax.random.split(key, 4)
    bound1 = 1.0 / (input_shape ** 0.5)
    bound2 = 1.0 / (hidden_units ** 0.5)
    w1 = jax.random.uniform(k1, (input_shape, hidden_units), jnp.float32, -bound1, bound1)
    b1 = jax.random.uniform(k2, (1, hidden_units), jnp.float32, -bound1, bound1)
    w2 = jax.random.uniform(k3, (hidden_units, output_shape), jnp.float32, -bound2, bound2)
    b2 = jax.random.uniform(k4, (1, output_shape), jnp.float32, -bound2, bound2)
    return w1, b1, w2, b2


if __name__ == "__main__":
    # FashionMNIST-like shapes: 28x28 grayscale images, 10 classes, small batch.
    B, C, H, W = 8, 1, 28, 28
    input_shape = C * H * W        # 784
    hidden_units = 32
    output_shape = 10

    key = jax.random.PRNGKey(0)
    kx, kp = jax.random.split(key)
    x = jax.random.normal(kx, (B, C, H, W), dtype=jnp.float32)
    w1, b1, w2, b2 = init_params(kp, input_shape, hidden_units, output_shape)

    # One-time setup: fuse + pad + bf16-cast the weights.
    wf, bf, d_out = prepare_params(w1, b1, w2, b2)

    out = fashion_mnist_model_v0(x, wf, bf, d_out)
    out = jax.block_until_ready(out)
    assert out.shape == (B, output_shape)

    x_flat = x.reshape(B, -1)

    # 1) Matched-precision reference (same fused bf16 weights, f32 accumulation):
    #    the kernel must agree tightly with this.
    ref_matched = (
        jnp.dot(x_flat.astype(jnp.bfloat16), wf, preferred_element_type=jnp.float32) + bf
    )[:, :d_out]
    assert jnp.allclose(out, ref_matched, atol=1e-4, rtol=1e-4), "mismatch vs matched bf16 reference"

    # 2) Full-precision PyTorch-equivalent reference: looser tolerance accounts only for
    #    the bf16 weight/activation rounding introduced by the optimization.
    ref_exact = (x_flat @ w1 + b1) @ w2 + b2
    assert jnp.allclose(out, ref_exact, atol=2e-2, rtol=2e-2), "mismatch vs f32 reference"

    print("KERNEL_OK")
</pallas_src>

<mosaic_0001>
module attributes {stable_mosaic.version = 11 : i64} {
  func.func @_fused_linear_kernel(%arg0: i32, %arg1: memref<8x784xbf16, #tpu.memory_space<vmem>>, %arg2: memref<784x128xbf16, #tpu.memory_space<vmem>>, %arg3: memref<1x128xf32, #tpu.memory_space<vmem>>, %arg4: memref<8x128xf32, #tpu.memory_space<vmem>>) attributes {dimension_semantics = [#tpu.dimension_semantics<parallel>], iteration_bounds = array<i64: 1>, scalar_prefetch = 0 : i64, scratch_operands = 0 : i64, tpu.core_type = #tpu.core_type<tc>, window_params = [{transform_indices = @transform_0, window_bounds = array<i64: 8, 784>}, {pipeline_mode = #tpu.pipeline_mode<synchronous>, transform_indices = @transform_1, window_bounds = array<i64: 784, 128>}, {pipeline_mode = #tpu.pipeline_mode<synchronous>, transform_indices = @transform_2, window_bounds = array<i64: 1, 128>}, {transform_indices = @transform_3, window_bounds = array<i64: 8, 128>}]} {
    %c0 = arith.constant 0 : index
    %c0_0 = arith.constant 0 : index
    %0 = vector.load %arg1[%c0, %c0_0] : memref<8x784xbf16, #tpu.memory_space<vmem>>, vector<8x784xbf16>
    %c0_1 = arith.constant 0 : index
    %c0_2 = arith.constant 0 : index
    %1 = vector.load %arg2[%c0_1, %c0_2] : memref<784x128xbf16, #tpu.memory_space<vmem>>, vector<784x128xbf16>
    %cst = arith.constant dense<0.000000e+00> : vector<8x128xf32>
    %2 = tpu.matmul %0, %1, %cst {dimension_numbers = #tpu.dot_dimension_numbers<[1], [0], [0], [1], [0, 0, 1, 1], [], []>} : vector<8x784xbf16>, vector<784x128xbf16>, vector<8x128xf32> -> vector<8x128xf32>
    %c0_3 = arith.constant 0 : index
    %c0_4 = arith.constant 0 : index
    %3 = vector.load %arg3[%c0_3, %c0_4] : memref<1x128xf32, #tpu.memory_space<vmem>>, vector<1x128xf32>
    %4 = vector.broadcast %3 : vector<1x128xf32> to vector<8x128xf32>
    %5 = arith.addf %2, %4 : vector<8x128xf32>
    %c0_5 = arith.constant 0 : index
    %c0_6 = arith.constant 0 : index
    %6 = vector.load %arg4[%c0_5, %c0_6] : memref<8x128xf32, #tpu.memory_space<vmem>>, vector<8x128xf32>
    tpu.vector_store %arg4[%c0_5, %c0_6], %5 {strides = array<i32>} : memref<8x128xf32, #tpu.memory_space<vmem>>, vector<8x128xf32>,
    return
  }
  func.func @transform_0(%arg0: i32) -> (i32, i32) {
    %c0_i32 = arith.constant 0 : i32
    %c0_i32_0 = arith.constant 0 : i32
    return %arg0, %c0_i32 : i32, i32
  }
  func.func @transform_1(%arg0: i32) -> (i32, i32) {
    %c0_i32 = arith.constant 0 : i32
    %c0_i32_0 = arith.constant 0 : i32
    %c0_i32_1 = arith.constant 0 : i32
    return %c0_i32, %c0_i32_0 : i32, i32
  }
  func.func @transform_2(%arg0: i32) -> (i32, i32) {
    %c0_i32 = arith.constant 0 : i32
    %c0_i32_0 = arith.constant 0 : i32
    %c0_i32_1 = arith.constant 0 : i32
    return %c0_i32, %c0_i32_0 : i32, i32
  }
  func.func @transform_3(%arg0: i32) -> (i32, i32) {
    %c0_i32 = arith.constant 0 : i32
    %c0_i32_0 = arith.constant 0 : i32
    return %arg0, %c0_i32 : i32, i32
  }
}

</mosaic_0001>

<bundles_post_ra>
// kernel: tpu_custom_call.1
= control target key start
LH: loop header
LB: loop body
LE: loop exit
PB: predicated region body
PF: predicated region fallthrough
CT: control target
= control target key end

     0   :  { %8 = vsyncpa [#allocation3], 0  ;;  %s951_s0 = inlined_call_operand.hbm [shape: bf16[8,784], index: 0, kind: input, shape index: {}]   ;;  %s952_s1 = inlined_call_operand.hbm [shape: bf16[784,128], index: 1, kind: input, shape index: {}]   ;;  %s953_s2 = inlined_call_operand.vmem [shape: f32[1,128], index: 2, kind: input, shape index: {}]   ;;  %s954_s3 = inlined_call_operand.hbm [shape: f32[8,128], index: 3, kind: output, shape index: {}]  }
   0x1   :  { %9 = vsyncpa [#allocation6], 0 }
   0x2   :  { %10 = vsyncpa [#allocation4], 0  ;;  %s16_s14 = sshll.u32 %s951_s0, 4  ;;  %s914_s15 = smov [#allocation2]   ;;  %s17_s14 = int_to_ptr.hbm [resolvable:$true] %s16_s14 }
   0x3   :  { %s18_s16 = sshll.u32 %s914_s15, 4  ;;  %s26_s19 = sshll.u32 %s952_s1, 4  ;;  %s19_s16 = int_to_ptr.vmem [resolvable:$true] %s18_s16  ;;  %s27_s19 = int_to_ptr.hbm [resolvable:$true] %s26_s19 }
   0x4   :  { %21 = dma.hbm_to_vmem [thread:$0]  %s17_s14, 448, %s19_s16, [#allocation3]  }
   0x5   :  { %s915_s20 = smov [#allocation5]   ;;  %s916_s22 = smov 64  }
   0x6   :  { %s28_s21 = sshll.u32 %s915_s20, 4  ;;  %s917_s23 = smov 4   ;;  %s29_s21 = int_to_ptr.vmem [resolvable:$true] %s28_s21 }
   0x7   :  { %34 = dma.hbm_to_vmem [thread:$0]  %s27_s19, 6272, %s29_s21, [#allocation6], %s916_s22, %s916_s22, %s917_s23  }
   0x8   :  { %908 = dma.done.wait [#allocation3], 448  }
   0x9   :  { %909 = vsyncadd [#allocation3], 4294966848 }
   0xa   :  { %910 = dma.done.wait [#allocation6], 6272  }
   0xb   :  { %911 = vsyncadd [#allocation6], 4294961024  ;;  %v788_v0 = vld [vmem:[#allocation5 + $0x38] sm:$0xff]  ;;  %v787_v3 = vld [vmem:[#allocation5 + $0x30] sm:$0xff]  ;;  %vm470_vm0 = vcmask 130048   ;;  %s918_s24 = smov [#allocation7]  }
   0xc   :  { %v796_v1 = vld [vmem:[#allocation5 + $0x78] sm:$0xff]  ;;  %474 = vmatpush.bf16.msra.mxu0 %v788_v0  ;;  %v795_v4 = vld [vmem:[#allocation5 + $0x70] sm:$0xff]  ;;  %v786_v8 = vld [vmem:[#allocation5 + $0x28] sm:$0xff]  ;;  %s571_s25 = sshll.u32 %s918_s24, 4  ;;  %s573_s28 = sshll.u32 %s954_s3, 4  ;;  %s572_s25 = int_to_ptr.vmem [resolvable:$true] %s571_s25  ;;  %s574_s28 = int_to_ptr.hbm [resolvable:$true] %s573_s28 }
   0xd   :  { %v804_v2 = vld [vmem:[#allocation5 + $0xb8] sm:$0xff]  ;;  %487 = vmatpush.bf16.msra.mxu1 %v796_v1  ;;  %v803_v5 = vld [vmem:[#allocation5 + $0xb0] sm:$0xff]  ;;  %v794_v9 = vld [vmem:[#allocation5 + $0x68] sm:$0xff] }
   0xe   :  { %500 = vmatpush.bf16.msra.mxu2 %v804_v2  ;;  %v812_v6 = vld [vmem:[#allocation5 + $0xf8] sm:$0xff]  ;;  %v811_v7 = vld [vmem:[#allocation5 + $0xf0] sm:$0xff]  ;;  %v802_v10 = vld [vmem:[#allocation5 + $0xa8] sm:$0xff] }
   0xf   :  { %513 = vmatpush.bf16.msra.mxu3 %v812_v6  ;;  %v810_v11 = vld [vmem:[#allocation5 + $0xe8] sm:$0xff]  ;;  %v785_v12 = vld [vmem:[#allocation5 + $0x20] sm:$0xff]  ;;  %v784_v16 = vld [vmem:[#allocation5 + $0x18] sm:$0xff] }
  0x10   :  { %475 = vmatpush.bf16.msra.mxu0 %v787_v3  ;;  %v793_v13 = vld [vmem:[#allocation5 + $0x60] sm:$0xff]  ;;  %v792_v17 = vld [vmem:[#allocation5 + $0x58] sm:$0xff]  ;;  %v783_v20 = vld [vmem:[#allocation5 + $0x10] sm:$0xff] }
  0x11   :  { %488 = vmatpush.bf16.msra.mxu1 %v795_v4  ;;  %v801_v14 = vld [vmem:[#allocation5 + $0xa0] sm:$0xff]  ;;  %v800_v18 = vld [vmem:[#allocation5 + $0x98] sm:$0xff]  ;;  %v791_v21 = vld [vmem:[#allocation5 + $0x50] sm:$0xff] }
  0x12   :  { %501 = vmatpush.bf16.msra.mxu2 %v803_v5  ;;  %v809_v15 = vld [vmem:[#allocation5 + $0xe0] sm:$0xff]  ;;  %v808_v19 = vld [vmem:[#allocation5 + $0xd8] sm:$0xff]  ;;  %v799_v22 = vld [vmem:[#allocation5 + $0x90] sm:$0xff] }
  0x13   :  { %514 = vmatpush.bf16.msra.mxu3 %v811_v7  ;;  %v807_v23 = vld [vmem:[#allocation5 + $0xd0] sm:$0xff]  ;;  %v782_v24 = vld [vmem:[#allocation5 + $0x8] sm:$0xff]  ;;  %v781_v32 = vld [vmem:[#allocation5] sm:$0xff] }
  0x14   :  { %476 = vmatpush.bf16.msra.mxu0 %v786_v8  ;;  %v790_v25 = vld [vmem:[#allocation5 + $0x48] sm:$0xff]  ;;  %v789_v33 = vld [vmem:[#allocation5 + $0x40] sm:$0xff]  ;;  %v820_v36 = vld [vmem:[#allocation5 + $0x138] sm:$0xff] }
  0x15   :  { %489 = vmatpush.bf16.msra.mxu1 %v794_v9  ;;  %v46_v26 = vld [vmem:[#allocation2] sm:$0xff]  ;;  %v47_v28 = vld [vmem:[#allocation2 + $0x8] sm:$0xff]  ;;  %v828_v37 = vld [vmem:[#allocation5 + $0x178] sm:$0xff] }
  0x16   :  { %502 = vmatpush.bf16.msra.mxu2 %v802_v10  ;;  %v798_v27 = vld [vmem:[#allocation5 + $0x88] sm:$0xff]  ;;  %v156_v30 = vunpack.c.l.b16 %v46_v26  ;;  %v157_v31 = vunpack.c.h.b16 %v46_v26  ;;  %v158_v34 = vunpack.c.l.b16 %v47_v28  ;;  %v797_v35 = vld [vmem:[#allocation5 + $0x80] sm:$0xff]  ;;  %v159_v41 = vunpack.c.h.b16 %v47_v28  ;;  %v819_v44 = vld [vmem:[#allocation5 + $0x130] sm:$0xff] }
  0x17   :  { %515 = vmatpush.bf16.msra.mxu3 %v810_v11  ;;  %v806_v29 = vld [vmem:[#allocation5 + $0xc8] sm:$0xff]  ;;  %v829_v38 = vld [vmem:[#allocation5 + $0x180] sm:$0xff]  ;;  %v827_v45 = vld [vmem:[#allocation5 + $0x170] sm:$0xff] }
  0x18   :  { %477 = vmatpush.bf16.msra.mxu0 %v785_v12  ;;  %v163_v39 = vpack.c.b16 %v156_v30, %v156_v30  ;;  %v164_v40 = vpack.c.b16 %v157_v31, %v157_v31  ;;  %v165_v42 = vpack.c.b16 %v158_v34, %v158_v34  ;;  %v805_v43 = vld [vmem:[#allocation5 + $0xc0] sm:$0xff]  ;;  %v166_v46 = vpack.c.b16 %v159_v41, %v159_v41  ;;  %v818_v47 = vld [vmem:[#allocation5 + $0x128] sm:$0xff]  ;;  %v49_v50 = vld [vmem:[#allocation2 + $0x18] sm:$0xf] }
  0x19   :  { %490 = vmatpush.bf16.msra.mxu1 %v793_v13  ;;  %v826_v48 = vld [vmem:[#allocation5 + $0x168] sm:$0xff]  ;;  %v817_v49 = vld [vmem:[#allocation5 + $0x120] sm:$0xff]  ;;  %v162_v52 = vunpack.c.l.b16 %v49_v50  ;;  %v816_v53 = vld [vmem:[#allocation5 + $0x118] sm:$0xff] }
  0x1a   :  { %503 = vmatpush.bf16.msra.mxu2 %v801_v14  ;;  %v825_v51 = vld [vmem:[#allocation5 + $0x160] sm:$0xff]  ;;  %v824_v54 = vld [vmem:[#allocation5 + $0x158] sm:$0xff]  ;;  %v815_v56 = vld [vmem:[#allocation5 + $0x110] sm:$0xff] }
  0x1b   :  { %516 = vmatpush.bf16.msra.mxu3 %v809_v15  ;;  %v169_v55 = vpack.c.b16 %v162_v52, %v162_v52  ;;  %v823_v57 = vld [vmem:[#allocation5 + $0x150] sm:$0xff]  ;;  %v814_v58 = vld [vmem:[#allocation5 + $0x108] sm:$0xff]  ;;  %v813_v62 = vld [vmem:[#allocation5 + $0x100] sm:$0xff] }
  0x1c   :  { %478 = vmatpush.bf16.msra.mxu0 %v784_v16  ;;  %v48_v59 = vld [vmem:[#allocation2 + $0x10] sm:$0xff]  ;;  %v822_v60 = vld [vmem:[#allocation5 + $0x148] sm:$0xff]  ;;  %v821_v0 = vld [vmem:[#allocation5 + $0x140] sm:$0xff] }
  0x1d   :  { %491 = vmatpush.bf16.msra.mxu1 %v792_v17  ;;  %v160_v61 = vunpack.c.l.b16 %v48_v59  ;;  %v161_v63 = vunpack.c.h.b16 %v48_v59  ;;  %v835_v9 = vld [vmem:[%s953_s2] ss:$0 sm:$0xff] }
  0x1e   :  { %504 = vmatpush.bf16.msra.mxu2 %v800_v18 }
  0x1f   :  { %517 = vmatpush.bf16.msra.mxu3 %v808_v19  ;;  %v167_v1 = vpack.c.b16 %v160_v61, %v160_v61  ;;  %v168_v2 = vpack.c.b16 %v161_v63, %v161_v63 }
  0x20   :  { %479 = vmatpush.bf16.msra.mxu0 %v783_v20 }
  0x21   :  { %492 = vmatpush.bf16.msra.mxu1 %v791_v21 }
  0x22   :  { %505 = vmatpush.bf16.msra.mxu2 %v799_v22 }
  0x23   :  { %518 = vmatpush.bf16.msra.mxu3 %v807_v23 }
  0x24   :  { %480 = vmatpush.bf16.msra.mxu0 %v782_v24 }
  0x25   :  { %493 = vmatpush.bf16.msra.mxu1 %v790_v25 }
  0x26   :  { %506 = vmatpush.bf16.msra.mxu2 %v798_v27 }
  0x27   :  { %519 = vmatpush.bf16.msra.mxu3 %v806_v29 }
  0x28   :  { %481 = vmatpush.bf16.msra.mxu0 %v781_v32 }
  0x29   :  { %494 = vmatpush.bf16.msra.mxu1 %v789_v33 }
  0x2a   :  { %507 = vmatpush.bf16.msra.mxu2 %v797_v35 }
  0x2b   :  { %482 = vmatmul.bf16.vlgmr.msra.gmra.mxu0 %v163_v39  ;;  %520 = vmatpush.bf16.msra.mxu3 %v805_v43 }
  0x2c   :  { %526 = vmatpush.bf16.msrb.mxu0 %v820_v36  ;;  %495 = vmatmul.bf16.vlgmr.msra.gmra.mxu1 %v164_v40 }
  0x2d   :  { %539 = vmatpush.bf16.msrb.mxu1 %v828_v37  ;;  %508 = vmatmul.bf16.vlgmr.msra.gmra.mxu2 %v165_v42 }
  0x2e   :  { %559 = vmatpush.bf16.msrb.mxu2 %v829_v38  ;;  %521 = vmatmul.bf16.vlgmr.msra.gmra.mxu3 %v166_v46 }
  0x30   :  { %527 = vmatpush.bf16.msrb.mxu0 %v819_v44 }
  0x31   :  { %540 = vmatpush.bf16.msrb.mxu1 %v827_v45 }
  0x34   :  { %528 = vmatpush.bf16.msrb.mxu0 %v818_v47 }
  0x35   :  { %541 = vmatpush.bf16.msrb.mxu1 %v826_v48 }
  0x38   :  { %529 = vmatpush.bf16.msrb.mxu0 %v817_v49 }
  0x39   :  { %542 = vmatpush.bf16.msrb.mxu1 %v825_v51 }
  0x3c   :  { %530 = vmatpush.bf16.msrb.mxu0 %v816_v53 }
  0x3d   :  { %543 = vmatpush.bf16.msrb.mxu1 %v824_v54  ;;  %780 = vmatmul.msk.bf16.vlgmr.msrb.gmra.mxu2 %vm470_vm0, %v169_v55 }
  0x40   :  { %531 = vmatpush.bf16.msrb.mxu0 %v815_v56 }
  0x41   :  { %544 = vmatpush.bf16.msrb.mxu1 %v823_v57 }
  0x44   :  { %532 = vmatpush.bf16.msrb.mxu0 %v814_v58 }
  0x45   :  { %545 = vmatpush.bf16.msrb.mxu1 %v822_v60 }
  0x48   :  { %533 = vmatpush.bf16.msrb.mxu0 %v813_v62 }
  0x49   :  { %546 = vmatpush.bf16.msrb.mxu1 %v821_v0 }
  0x4b   :  { %534 = vmatmul.bf16.vlgmr.msrb.gmra.mxu0 %v167_v1 }
  0x4c   :  { %547 = vmatmul.bf16.vlgmr.msrb.gmra.mxu1 %v168_v2 }
  0xa8   :  { %v483_v3 = vpop.f32.mrf.mxu0 }
  0xa9   :  { %v496_v4 = vpop.f32.mrf.mxu1  ;;  %v484_v11 = vadd.f32 %v835_v9, %v483_v3 }
  0xab   :  { %v497_v13 = vadd.f32 %v496_v4, %v484_v11 }
  0xb0   :  { %v509_v5 = vpop.f32.mrf.mxu2  ;;  %v485_v6 = vpop.f32.mrf.mxu0 }
  0xb1   :  { %v498_v7 = vpop.f32.mrf.mxu1  ;;  %v522_v8 = vpop.f32.mrf.mxu3  ;;  %v510_v15 = vadd.f32 %v509_v5, %v497_v13 }
  0xb3   :  { %v523_v16 = vadd.f32 %v522_v8, %v510_v15 }
  0xb8   :  { %v511_v10 = vpop.f32.mrf.mxu2 }
  0xb9   :  { %v524_v12 = vpop.f32.mrf.mxu3 }
  0xc0   :  { %v561_v14 = vpop.f32.mrf.mxu2 }
  0xc8   :  { %v535_v17 = vpop.f32.mrf.mxu0  ;;  %v563_v20 = vpop.f32.mrf.mxu2 }
  0xc9   :  { %v536_v18 = vadd.f32 %v535_v17, %v523_v16  ;;  %v548_v19 = vpop.f32.mrf.mxu1 }
  0xcb   :  { %v549_v21 = vadd.f32 %v548_v19, %v536_v18 }
  0xcd   :  { %v562_v22 = vadd.f32 %v561_v14, %v549_v21 }
  0xcf   :  { %565 = vst [vmem:[#allocation7] sm:$0xff] %v562_v22 }
  0xd0   :  { %v537_v23 = vpop.f32.mrf.mxu0  ;;  %576 = dma.vmem_to_hbm [thread:$0]  %s572_s25, 128, %s574_s28, [#allocation4]  }
  0xd1   :  { %v550_v24 = vpop.f32.mrf.mxu1 }
  0xd2   :  { %912 = dma.done.wait [#allocation4], 128  }
  0xd3   :  { %913 = vsyncadd [#allocation4], 4294967168 }
  0xd4   :  { %581 = vsyncpa [#allocation3], 1 }
  0xd5   :  { %582 = vsyncpa [#allocation6], 1 }
  0xd6   :  { %583 = vsyncpa [#allocation4], 1 }

</bundles_post_ra>
